<compile_context>
chip_gen: v7x
topology: tpu7x:2x2x1
jax: 0.10.0
libtpu: 0.0.40
codegen_flags: <defaults>
</compile_context>

<pallas_src>
import math

import jax
import jax.numpy as jnp
from jax.experimental import pallas as pl
from jax.experimental.pallas import tpu as pltpu

# ---- module hyper-parameters (deterministic, in-script) --------------------
DERIVATIVE_ORDER = 0.5   # alpha
N_TERMS = 5              # n
MIN_STEP = 1e-6
MAX_STEP = 1e-3

TARGET_TILE_BYTES = 2 << 20   # ~2 MiB per input tile (8 MiB of double buffers total)


def _caputo_coeffs(alpha: float, n: int):
    # c_k = (-1)^k * exp(lgamma(alpha+k+1)) / (k! * exp(lgamma(alpha+1)))
    return tuple(
        ((-1.0) ** k)
        * math.exp(math.lgamma(alpha + k + 1.0))
        / (math.factorial(k) * math.exp(math.lgamma(alpha + 1.0)))
        for k in range(n)
    )


COEFFS = _caputo_coeffs(DERIVATIVE_ORDER, N_TERMS)

# Telescoped weights:  sum_k c_k (f_k - f_{k+1})  ==  sum_{j=0}^{n} W[j] * f_j
# with f_j = tanh(x - j*h).  One multiply/FMA per tanh instead of sub+mul per term.
W = (
    (COEFFS[0],)
    + tuple(COEFFS[k] - COEFFS[k - 1] for k in range(1, N_TERMS))
    + (-COEFFS[N_TERMS - 1],)
)


# ---- Pallas kernel (tiled, elementwise) ------------------------------------
def _caputo_kernel(stats_ref, x_ref, o_ref):
    # stats_ref: (2,) f32 in SMEM -> [mean, (MAX_STEP-MIN_STEP)/std]
    mean = stats_ref[0]
    scale = stats_ref[1]

    x = x_ref[...].astype(jnp.float32)

    # adaptive_step_size with the std-divide hoisted into the precomputed scalar `scale`
    h = MIN_STEP + (x - mean) * scale

    # base activation f(x) == f_0, reused as the first telescoped term
    base = jnp.tanh(x)
    acc = W[0] * base

    xs = x
    for w in W[1:]:
        xs = xs - h                       # x - j*h, updated incrementally
        acc = acc + w * jnp.tanh(xs)

    # acc / h  ->  acc * recip(h).  EUP approx reciprocal + one Newton step (2 free VPU FMAs,
    # EUP is the saturated slot) so the ~2^-12 approx error is not 1/h-amplified into the output.
    inv_h = pl.reciprocal(h, approx=True)
    inv_h = inv_h * (2.0 - h * inv_h)

    o_ref[...] = (base + acc * inv_h).astype(o_ref.dtype)


# ---- wrapper ----------------------------------------------------------------
def caputo_fractional_activation(x, *, donate_input=False):
    """donate_input=True aliases x's buffer to the output (only if x is dead after the call)."""
    orig_shape = x.shape
    total = x.size
    assert total % 128 == 0, "demo wrapper requires numel % 128 == 0"
    # TODO(synk): add a pad+mask path (masking the stats reduction too) for arbitrary numel.

    # Lane-dense 2-D view in the *native* dtype (reshape is a free bitcast).
    lane = next(l for l in (1024, 512, 256, 128) if total % l == 0)
    rows = total // lane
    x2d = x.reshape(rows, lane)

    # ---- Phase 1: one-pass global stats (single fused HBM read under jit) ----
    xf = x2d.astype(jnp.float32)
    n = jnp.float32(total)
    m1 = jnp.mean(xf)
    m2 = jnp.mean(xf * xf)
    var = jnp.maximum(m2 - m1 * m1, 0.0) * (n / (n - 1.0))   # unbiased (torch.std default)
    # NOTE: one-pass var loses precision only if |mean| >> std (not the case for activations).
    # std == 0 (constant input) -> inf/NaN scale, matching the torch module.
    scale = (MAX_STEP - MIN_STEP) / jnp.sqrt(var)
    stats = jnp.stack([m1, scale]).astype(jnp.float32)

    # ---- Phase 2: tile selection — constant-byte (~2 MiB) tiles, sublane-aligned ----
    item = x.dtype.itemsize
    tile_rows = max(1, TARGET_TILE_BYTES // (lane * item))
    # Give the v7x megacore at least 2 grid steps whenever there is enough data;
    # a single-step grid would leave one TensorCore idle.
    if rows > 8 and tile_rows >= rows:
        tile_rows = -(-rows // 2)
    if tile_rows >= rows:
        tile_rows = rows                                   # full-extent block (any row count ok)
    else:
        tile_rows = max(8, (tile_rows // 8) * 8)           # keep (8, 128) tiling alignment

    grid = (pl.cdiv(rows, tile_rows),)

    cost = pl.CostEstimate(
        flops=22 * total,                   # ~VPU ops per element
        transcendentals=7 * total,          # 6x tanh + 1x reciprocal per element
        bytes_accessed=2 * total * item + 8,
    )

    out2d = pl.pallas_call(
        _caputo_kernel,
        out_shape=jax.ShapeDtypeStruct((rows, lane), x.dtype),
        grid=grid,
        in_specs=[
            pl.BlockSpec(memory_space=pltpu.MemorySpace.SMEM),      # (2,) scalars
            pl.BlockSpec((tile_rows, lane), lambda i: (i, 0)),      # x tile (native dtype)
        ],
        out_specs=pl.BlockSpec((tile_rows, lane), lambda i: (i, 0)),
        compiler_params=pltpu.CompilerParams(
            # "parallel" is the portable megacore-sharding annotation (v7x: 2 TCs);
            # CORE_PARALLEL was considered but "parallel" is safe on single-core v5e/v6e too.
            dimension_semantics=("parallel",),
        ),
        cost_estimate=cost,
        input_output_aliases=({1: 0} if donate_input else {}),
    )(stats, x2d)

    return out2d.reshape(orig_shape)


# ---- pure-JAX reference (faithful to the torch formula; sanity check only) --
def _reference(x):
    xf = x.reshape(-1).astype(jnp.float32)
    m = xf.size
    mean = jnp.mean(xf)
    std = jnp.sqrt(jnp.sum((xf - mean) ** 2) / (m - 1))
    h = MIN_STEP + (xf - mean) / std * (MAX_STEP - MIN_STEP)
    base = jnp.tanh(xf)
    acc = jnp.zeros_like(xf)
    for k in range(N_TERMS):
        acc = acc + COEFFS[k] * (jnp.tanh(xf - k * h) - jnp.tanh(xf - (k + 1.0) * h))
    return (base + acc / h).reshape(x.shape), h.reshape(x.shape)


if __name__ == "__main__":
    key = jax.random.PRNGKey(0)
    x = jax.random.normal(key, (2, 4, 16, 16), dtype=jnp.float32)

    fn = jax.jit(caputo_fractional_activation)
    out = jax.block_until_ready(fn(x))
    assert out.shape == x.shape and out.dtype == x.dtype

    ref, h = _reference(x)
    # The torch formula divides by h, which can be arbitrarily close to 0 for some elements;
    # there tiny differences between algebraically identical evaluation orders are amplified
    # by up to 1/h, so restrict the numerical comparison to well-conditioned elements.
    ok_mask = jnp.abs(h) >= 2e-4
    diff = jnp.where(ok_mask, jnp.abs(out - ref), 0.0)
    max_diff = float(jnp.max(diff))
    assert max_diff < 5e-2, max_diff

    print("KERNEL_OK")
</pallas_src>

<mosaic_0001>
module attributes {stable_mosaic.version = 11 : i64} {
  func.func @_caputo_kernel(%arg0: i32, %arg1: memref<2xf32, #tpu.memory_space<smem>>, %arg2: memref<2x1024xf32, #tpu.memory_space<vmem>>, %arg3: memref<2x1024xf32, #tpu.memory_space<vmem>>) attributes {dimension_semantics = [#tpu.dimension_semantics<parallel>], iteration_bounds = array<i64: 1>, scalar_prefetch = 0 : i64, scratch_operands = 0 : i64, tpu.core_type = #tpu.core_type<tc>, window_params = [{transform_indices = @transform_0, window_bounds = array<i64: 2>}, {transform_indices = @transform_1, window_bounds = array<i64: 2, 1024>}, {transform_indices = @transform_2, window_bounds = array<i64: 2, 1024>}]} {
    %c0 = arith.constant 0 : index
    %0 = memref.load %arg1[%c0] : memref<2xf32, #tpu.memory_space<smem>>
    %c1 = arith.constant 1 : index
    %1 = memref.load %arg1[%c1] : memref<2xf32, #tpu.memory_space<smem>>
    %c0_0 = arith.constant 0 : index
    %c0_1 = arith.constant 0 : index
    %2 = vector.load %arg2[%c0_0, %c0_1] : memref<2x1024xf32, #tpu.memory_space<vmem>>, vector<2x1024xf32>
    %3 = vector.broadcast %0 : f32 to vector<2x1024xf32>
    %4 = arith.subf %2, %3 : vector<2x1024xf32>
    %5 = vector.broadcast %1 : f32 to vector<2x1024xf32>
    %6 = arith.mulf %4, %5 : vector<2x1024xf32>
    %cst = arith.constant 9.99999997E-7 : f32
    %7 = vector.broadcast %cst : f32 to vector<2x1024xf32>
    %8 = arith.addf %7, %6 : vector<2x1024xf32>
    %9 = math.tanh %2 : vector<2x1024xf32>
    %cst_2 = arith.constant 1.000000e+00 : f32
    %10 = vector.broadcast %cst_2 : f32 to vector<2x1024xf32>
    %11 = arith.mulf %10, %9 : vector<2x1024xf32>
    %12 = arith.subf %2, %8 : vector<2x1024xf32>
    %13 = math.tanh %12 : vector<2x1024xf32>
    %cst_3 = arith.constant -2.500000e+00 : f32
    %14 = vector.broadcast %cst_3 : f32 to vector<2x1024xf32>
    %15 = arith.mulf %14, %13 : vector<2x1024xf32>
    %16 = arith.addf %11, %15 : vector<2x1024xf32>
    %17 = arith.subf %12, %8 : vector<2x1024xf32>
    %18 = math.tanh %17 : vector<2x1024xf32>
    %cst_4 = arith.constant 3.375000e+00 : f32
    %19 = vector.broadcast %cst_4 : f32 to vector<2x1024xf32>
    %20 = arith.mulf %19, %18 : vector<2x1024xf32>
    %21 = arith.addf %16, %20 : vector<2x1024xf32>
    %22 = arith.subf %17, %8 : vector<2x1024xf32>
    %23 = math.tanh %22 : vector<2x1024xf32>
    %cst_5 = arith.constant -4.062500e+00 : f32
    %24 = vector.broadcast %cst_5 : f32 to vector<2x1024xf32>
    %25 = arith.mulf %24, %23 : vector<2x1024xf32>
    %26 = arith.addf %21, %25 : vector<2x1024xf32>
    %27 = arith.subf %22, %8 : vector<2x1024xf32>
    %28 = math.tanh %27 : vector<2x1024xf32>
    %cst_6 = arith.constant 4.6484375 : f32
    %29 = vector.broadcast %cst_6 : f32 to vector<2x1024xf32>
    %30 = arith.mulf %29, %28 : vector<2x1024xf32>
    %31 = arith.addf %26, %30 : vector<2x1024xf32>
    %32 = arith.subf %27, %8 : vector<2x1024xf32>
    %33 = math.tanh %32 : vector<2x1024xf32>
    %cst_7 = arith.constant -2.4609375 : f32
    %34 = vector.broadcast %cst_7 : f32 to vector<2x1024xf32>
    %35 = arith.mulf %34, %33 : vector<2x1024xf32>
    %36 = arith.addf %31, %35 : vector<2x1024xf32>
    %37 = tpu.reciprocal %8 {approx = true} : vector<2x1024xf32> -> vector<2x1024xf32>
    %38 = arith.mulf %8, %37 : vector<2x1024xf32>
    %cst_8 = arith.constant 2.000000e+00 : f32
    %39 = vector.broadcast %cst_8 : f32 to vector<2x1024xf32>
    %40 = arith.subf %39, %38 : vector<2x1024xf32>
    %41 = arith.mulf %37, %40 : vector<2x1024xf32>
    %42 = arith.mulf %36, %41 : vector<2x1024xf32>
    %43 = arith.addf %9, %42 : vector<2x1024xf32>
    %c0_9 = arith.constant 0 : index
    %c0_10 = arith.constant 0 : index
    %44 = vector.load %arg3[%c0_9, %c0_10] : memref<2x1024xf32, #tpu.memory_space<vmem>>, vector<2x1024xf32>
    tpu.vector_store %arg3[%c0_9, %c0_10], %43 {strides = array<i32>} : memref<2x1024xf32, #tpu.memory_space<vmem>>, vector<2x1024xf32>,
    return
  }
  func.func @transform_0(%arg0: i32) -> i32 {
    %c0_i32 = arith.constant 0 : i32
    %c0_i32_0 = arith.constant 0 : i32
    return %c0_i32 : i32
  }
  func.func @transform_1(%arg0: i32) -> (i32, i32) {
    %c0_i32 = arith.constant 0 : i32
    %c0_i32_0 = arith.constant 0 : i32
    return %arg0, %c0_i32 : i32, i32
  }
  func.func @transform_2(%arg0: i32) -> (i32, i32) {
    %c0_i32 = arith.constant 0 : i32
    %c0_i32_0 = arith.constant 0 : i32
    return %arg0, %c0_i32 : i32, i32
  }
}

</mosaic_0001>

<bundles_post_ra>
// kernel: caputo_fractional_activation.1
= control target key start
LH: loop header
LB: loop body
LE: loop exit
PB: predicated region body
PF: predicated region fallthrough
CT: control target
= control target key end

     0   :  { %7 = vsyncpa [#allocation3], 0  ;;  %s172_s0 = inlined_call_operand.vmem [shape: f32[2], index: 0, kind: input, shape index: {}]   ;;  %s173_s1 = inlined_call_operand.vmem [shape: f32[2,1024], index: 1, kind: input, shape index: {}]   ;;  %s174_s2 = inlined_call_operand.vmem [shape: f32[2,1024], index: 2, kind: output, shape index: {}]  }
   0x1   :  { %s14_s11 = sshll.u32 %s172_s0, 4  ;;  %s15_s11 = int_to_ptr.vmem [resolvable:$true] %s14_s11 }
   0x2   :  { %s127_s12 = scalar_lea.vmem %s15_s11, 16  ;;  %p132_p1 = scmp.lt.s32.totalorder %s15_s11, %s15_s11 }
   0x3   :  { %p128_p0 = scmp.ne.s32.totalorder %s15_s11, %s127_s12  ;;  %p133_p2 = scmp.lt.s32.totalorder %s127_s12, %s127_s12 }
   0x5   :  { %p134_p3 = por %p133_p2, %p132_p1 }
   0x7   :  { %p135_p4 = pnand %p134_p3, %p128_p0 }
   0x9   :  { %138 = shalt.err (!%p135_p4)
}
   0xa   :  { %s141_s13 = smov [#allocation2]  }
   0xb   :  { %17 = dma.vmem_to_smem %s15_s11, 16, %s141_s13, [#allocation3]  }
   0xc   :  { %139 = dma.done.wait [#allocation3], 16  }
   0xd   :  { %140 = vsyncadd [#allocation3], 4294967280 }
   0xe   :  { %23 = sfence }
   0xf   :  { %s24_s14 = sld [smem:[#allocation2]]  ;;  %s97_s15 = sld [smem:[#allocation2 + $0x1]]  ;;  %v26_v0 = vld [vmem:[%s173_s1] sm:$0xff]  ;;  %v27_v1 = vld [vmem:[%s173_s1 + $0x8] sm:$0xff] }
  0x10   :  { %99 = vtanh.f32 %v26_v0 }
  0x11   :  { %101 = vtanh.f32 %v27_v1 }
  0x15   :  { %v28_v2 = vstv %s24_s14  ;;  %v31_v3 = vstv %s97_s15 }
  0x16   :  { %v29_v4 = vsub.f32 %v26_v0, %v28_v2  ;;  %v30_v5 = vsub.f32 %v27_v1, %v28_v2 }
  0x18   :  { %v32_v6 = vmul.f32 %v31_v3, %v29_v4  ;;  %v33_v7 = vmul.f32 %v31_v3, %v30_v5 }
  0x1a   :  { %v34_v8 = vadd.f32 1e-06, %v32_v6  ;;  %v35_v9 = vadd.f32 1e-06, %v33_v7  ;;  %v100_v18 = vpop.eup %99 }
  0x1b   :  { %v102_v21 = vpop.eup %101 }
  0x1c   :  { %v38_v10 = vsub.f32 %v26_v0, %v34_v8  ;;  %103 = vrcp.f32 %v34_v8  ;;  %v39_v11 = vsub.f32 %v27_v1, %v35_v9 }
  0x1d   :  { %105 = vrcp.f32 %v35_v9 }
  0x1e   :  { %107 = vtanh.f32 %v38_v10  ;;  %v46_v12 = vsub.f32 %v38_v10, %v34_v8  ;;  %v47_v13 = vsub.f32 %v39_v11, %v35_v9 }
  0x1f   :  { %109 = vtanh.f32 %v39_v11 }
  0x20   :  { %111 = vtanh.f32 %v46_v12  ;;  %v54_v14 = vsub.f32 %v46_v12, %v34_v8  ;;  %v55_v15 = vsub.f32 %v47_v13, %v35_v9 }
  0x21   :  { %113 = vtanh.f32 %v47_v13 }
  0x22   :  { %115 = vtanh.f32 %v54_v14  ;;  %v62_v16 = vsub.f32 %v54_v14, %v34_v8  ;;  %v63_v17 = vsub.f32 %v55_v15, %v35_v9 }
  0x23   :  { %117 = vtanh.f32 %v55_v15 }
  0x24   :  { %119 = vtanh.f32 %v62_v16  ;;  %v70_v19 = vsub.f32 %v62_v16, %v34_v8  ;;  %v71_v20 = vsub.f32 %v63_v17, %v35_v9 }
  0x25   :  { %121 = vtanh.f32 %v63_v17 }
  0x26   :  { %v104_v22 = vpop.eup %103  ;;  %123 = vtanh.f32 %v70_v19 }
  0x27   :  { %v106_v23 = vpop.eup %105  ;;  %125 = vtanh.f32 %v71_v20  ;;  %v80_v27 = vmul.f32 %v104_v22, %v34_v8 }
  0x28   :  { %v108_v24 = vpop.eup %107  ;;  %v81_v30 = vmul.f32 %v106_v23, %v35_v9 }
  0x29   :  { %v110_v25 = vpop.eup %109  ;;  %v42_v26 = vmul.f32 -2.5, %v108_v24  ;;  %v82_v40 = vsub.f32 2.0, %v80_v27 }
  0x2a   :  { %v112_v28 = vpop.eup %111  ;;  %v43_v29 = vmul.f32 -2.5, %v110_v25  ;;  %v83_v44 = vsub.f32 2.0, %v81_v30 }
  0x2b   :  { %v114_v31 = vpop.eup %113  ;;  %v44_v32 = vadd.f32 %v100_v18, %v42_v26  ;;  %v50_v33 = vmul.f32 3.375, %v112_v28  ;;  %v84_v54 = vmul.f32 %v104_v22, %v82_v40 }
  0x2c   :  { %v116_v34 = vpop.eup %115  ;;  %v45_v35 = vadd.f32 %v102_v21, %v43_v29  ;;  %v51_v36 = vmul.f32 3.375, %v114_v31  ;;  %v85_v57 = vmul.f32 %v106_v23, %v83_v44 }
  0x2d   :  { %v118_v37 = vpop.eup %117  ;;  %v52_v38 = vadd.f32 %v50_v33, %v44_v32  ;;  %v58_v39 = vmul.f32 -4.0625, %v116_v34 }
  0x2e   :  { %v120_v41 = vpop.eup %119  ;;  %v53_v42 = vadd.f32 %v51_v36, %v45_v35  ;;  %v59_v43 = vmul.f32 -4.0625, %v118_v37 }
  0x2f   :  { %v122_v45 = vpop.eup %121  ;;  %v60_v46 = vadd.f32 %v58_v39, %v52_v38  ;;  %v66_v47 = vmul.f32 4.6484375, %v120_v41 }
  0x30   :  { %v124_v48 = vpop.eup %123  ;;  %v61_v49 = vadd.f32 %v59_v43, %v53_v42  ;;  %v67_v50 = vmul.f32 4.6484375, %v122_v45 }
  0x31   :  { %v126_v51 = vpop.eup %125  ;;  %v68_v52 = vadd.f32 %v66_v47, %v60_v46  ;;  %v74_v53 = vmul.f32 -2.4609375, %v124_v48 }
  0x32   :  { %v69_v55 = vadd.f32 %v67_v50, %v61_v49  ;;  %v75_v56 = vmul.f32 -2.4609375, %v126_v51 }
  0x33   :  { %v76_v58 = vadd.f32 %v74_v53, %v68_v52 }
  0x34   :  { %v77_v59 = vadd.f32 %v75_v56, %v69_v55 }
  0x35   :  { %v86_v60 = vmul.f32 %v84_v54, %v76_v58 }
  0x36   :  { %v87_v61 = vmul.f32 %v85_v57, %v77_v59 }
  0x37   :  { %v88_v62 = vadd.f32 %v100_v18, %v86_v60 }
  0x38   :  { %v89_v63 = vadd.f32 %v102_v21, %v87_v61 }
  0x39   :  { %90 = vst [vmem:[%s174_s2] sm:$0xff] %v88_v62 }
  0x3a   :  { %91 = vst [vmem:[%s174_s2 + $0x8] sm:$0xff] %v89_v63 }
  0x3b   :  { %96 = vsyncpa [#allocation3], 1 }

</bundles_post_ra>
